<compile_context>
chip_gen: v7x
topology: tpu7x:2x2x1
jax: 0.10.0
libtpu: 0.0.40
codegen_flags: <defaults>
</compile_context>

<pallas_src>
import jax
import jax.numpy as jnp
from jax.experimental import pallas as pl
from jax.experimental.pallas import tpu as pltpu

_LANE = 128
_MIB = 1024 * 1024


def _chomp_kernel(x_ref, o_ref):
    # The chomp itself is expressed by block shapes / index maps; here we only
    # copy the leading o_ref.shape[-1] columns (a static slice).
    cols = o_ref.shape[-1]
    o_ref[...] = x_ref[:, :cols]


def _sublane_pack(dtype) -> int:
    # Sublane packing: 8 for 4-byte, 16 for 2-byte, 32 for 1-byte dtypes.
    itemsize = jnp.dtype(dtype).itemsize
    return max(8, 32 // max(itemsize, 1))


def _round_up(x: int, m: int) -> int:
    return ((x + m - 1) // m) * m


def _vmem_capacity_bytes() -> int:
    """Physical VMEM per TensorCore; conservative (v7x-sized) if unknown."""
    try:
        cap = getattr(pltpu.get_tpu_info(), "vmem_capacity_bytes", None)
        if cap:
            return int(cap)
    except Exception:
        pass
    try:
        kind = jax.devices()[0].device_kind.lower()
        if "v5" in kind or "v6" in kind:
            return 128 * _MIB
    except Exception:
        pass
    return 64 * _MIB  # v7x-sized: safe lower bound everywhere


def _tile_budget_bytes(vmem_cap: int, override=None) -> int:
    """Target input bytes per grid step (double-buffered in+out ~= 4x this)."""
    if override is not None:
        return int(override)
    if vmem_cap >= 96 * _MIB:
        # v5e / v6e (128 MiB VMEM): 2*(12+12) = 48 MiB double-buffered.
        return 12 * _MIB
    # v7x (64 MiB VMEM): 2*(6+6) = 24 MiB, under the 32 MiB scoped default.
    return 6 * _MIB


def chomp1d(x: jax.Array, chomp_size: int, *, target_block_bytes=None) -> jax.Array:
    """Equivalent of PyTorch Chomp1d: drop the last `chomp_size` elements of L."""
    n, c, l = x.shape
    assert 0 <= chomp_size < l, "chomp_size must be in [0, L)"
    if chomp_size == 0:
        # Treat as a no-op (TCN always uses chomp_size >= 1).
        return x

    l_out = l - chomp_size
    rows = n * c
    x2 = x.reshape(rows, l)

    itemsize = jnp.dtype(x.dtype).itemsize
    pack = _sublane_pack(x.dtype)
    vmem_cap = _vmem_capacity_bytes()
    target_in = _tile_budget_bytes(vmem_cap, target_block_bytes)

    # Input block width covering only [0, l_out), padded to lane alignment
    # (or the full row when the pad would reach past L anyway).
    tile_l_in_full = min(l, _round_up(l_out, _LANE))
    row_bytes = tile_l_in_full * itemsize

    if pack * row_bytes <= target_in:
        # Full-width path: 1-D row grid; the chomped tail past ceil128(l_out)
        # is never read, and there is no partial/masked column tile.
        tile_l_in, tile_l_out = tile_l_in_full, l_out
        tile_r = max(pack, (target_in // row_bytes) // pack * pack)
        if tile_r >= rows:
            tile_r = rows  # full-rows block also satisfies the tiling constraint
        grid = (pl.cdiv(rows, tile_r),)
        in_specs = [pl.BlockSpec((tile_r, tile_l_in), lambda i: (i, 0))]
        out_specs = pl.BlockSpec((tile_r, tile_l_out), lambda i: (i, 0))
        dim_sem = ("parallel",)
    else:
        # Very long rows: 128-aligned column tiles walking only [0, l_out).
        # The only over-read of the chomped tail is inside the final partial
        # column tile; those lanes land in masked output positions.
        max_tile_l = max(_LANE, (target_in // (pack * itemsize)) // _LANE * _LANE)
        tile_l = max(_LANE, min((l_out // _LANE) * _LANE, max_tile_l))
        tile_l_in = tile_l_out = tile_l
        tile_r = max(pack, (target_in // (tile_l * itemsize)) // pack * pack)
        if tile_r >= rows:
            tile_r = rows
        grid = (pl.cdiv(rows, tile_r), pl.cdiv(l_out, tile_l))
        in_specs = [pl.BlockSpec((tile_r, tile_l_in), lambda i, j: (i, j))]
        out_specs = pl.BlockSpec((tile_r, tile_l_out), lambda i, j: (i, j))
        # No reduction anywhere: both axes parallel (shards across v7x's 2 TCs).
        dim_sem = ("parallel", "parallel")

    # Scoped-VMEM budget: double-buffered input + output tiles plus Mosaic
    # internal-scratch headroom; never clipped below the actual requirement.
    needed = 2 * tile_r * (tile_l_in + tile_l_out) * itemsize
    vmem_limit = max(needed + 2 * _MIB, 8 * _MIB)

    out2 = pl.pallas_call(
        _chomp_kernel,
        out_shape=jax.ShapeDtypeStruct((rows, l_out), x.dtype),
        grid_spec=pltpu.PrefetchScalarGridSpec(
            num_scalar_prefetch=0,
            grid=grid,
            in_specs=in_specs,
            out_specs=out_specs,
        ),
        compiler_params=pltpu.CompilerParams(
            dimension_semantics=dim_sem,
            vmem_limit_bytes=int(vmem_limit),
        ),
    )(x2)

    return out2.reshape(n, c, l_out)


if __name__ == "__main__":
    key = jax.random.PRNGKey(0)

    # Case 1: small TCN-like shape — full-width (row-tiled) path, tiny L.
    N, C, L = 2, 4, 16
    CHOMP = 3  # (kernel_size - 1) * dilation = (4 - 1) * 1
    x = jax.random.normal(key, (N, C, L), dtype=jnp.float32)
    out = jax.block_until_ready(chomp1d(x, CHOMP))
    ref = x[:, :, :-CHOMP]
    assert out.shape == (N, C, L - CHOMP), out.shape
    assert out.dtype == x.dtype
    assert jnp.array_equal(out, ref), "mismatch vs reference slice (case 1)"

    # Case 2: longer sequence — full-width path where the input block is padded
    # to the 128-multiple covering only l_out (chomped tail never DMA'd).
    key2 = jax.random.fold_in(key, 1)
    N2, C2, L2, CHOMP2 = 2, 8, 512, 128
    x2 = jax.random.normal(key2, (N2, C2, L2), dtype=jnp.float32)
    out2 = jax.block_until_ready(chomp1d(x2, CHOMP2))
    ref2 = x2[:, :, :-CHOMP2]
    assert out2.shape == (N2, C2, L2 - CHOMP2), out2.shape
    assert jnp.array_equal(out2, ref2), "mismatch vs reference slice (case 2)"

    # Case 3: force the column-tiled fallback (tiny per-step budget) with bf16
    # and a non-128-multiple l_out to exercise the masked partial tail tile.
    key3 = jax.random.fold_in(key, 2)
    N3, C3, L3, CHOMP3 = 2, 8, 640, 100
    x3 = jax.random.normal(key3, (N3, C3, L3), dtype=jnp.bfloat16)
    out3 = jax.block_until_ready(chomp1d(x3, CHOMP3, target_block_bytes=16 * 1024))
    ref3 = x3[:, :, :-CHOMP3]
    assert out3.shape == (N3, C3, L3 - CHOMP3), out3.shape
    assert out3.dtype == x3.dtype
    assert jnp.array_equal(out3, ref3), "mismatch vs reference slice (case 3)"

    print("KERNEL_OK")
</pallas_src>

<mosaic_0001>
module attributes {stable_mosaic.version = 11 : i64} {
  func.func @_chomp_kernel(%arg0: i32, %arg1: memref<8x16xf32, #tpu.memory_space<vmem>>, %arg2: memref<8x13xf32, #tpu.memory_space<vmem>>) attributes {dimension_semantics = [#tpu.dimension_semantics<parallel>], iteration_bounds = array<i64: 1>, scalar_prefetch = 0 : i64, scratch_operands = 0 : i64, tpu.core_type = #tpu.core_type<tc>, window_params = [{transform_indices = @transform_0, window_bounds = array<i64: 8, 16>}, {transform_indices = @transform_1, window_bounds = array<i64: 8, 13>}]} {
    %c0 = arith.constant 0 : index
    %c0_0 = arith.constant 0 : index
    %0 = vector.load %arg1[%c0, %c0_0] : memref<8x16xf32, #tpu.memory_space<vmem>>, vector<8x13xf32>
    %c0_1 = arith.constant 0 : index
    %c0_2 = arith.constant 0 : index
    %1 = vector.load %arg2[%c0_1, %c0_2] : memref<8x13xf32, #tpu.memory_space<vmem>>, vector<8x13xf32>
    tpu.vector_store %arg2[%c0_1, %c0_2], %0 {strides = array<i32>} : memref<8x13xf32, #tpu.memory_space<vmem>>, vector<8x13xf32>,
    return
  }
  func.func @transform_0(%arg0: i32) -> (i32, i32) {
    %c0_i32 = arith.constant 0 : i32
    %c0_i32_0 = arith.constant 0 : i32
    return %arg0, %c0_i32 : i32, i32
  }
  func.func @transform_1(%arg0: i32) -> (i32, i32) {
    %c0_i32 = arith.constant 0 : i32
    %c0_i32_0 = arith.constant 0 : i32
    return %arg0, %c0_i32 : i32, i32
  }
}

</mosaic_0001>

<bundles_post_ra>
// kernel: tpu_custom_call.1
= control target key start
LH: loop header
LB: loop body
LE: loop exit
PB: predicated region body
PF: predicated region fallthrough
CT: control target
= control target key end

     0   :  { %6 = vsyncpa [#allocation3], 0  ;;  %s125_s0 = inlined_call_operand.hbm [shape: f32[8,16], index: 0, kind: input, shape index: {}]   ;;  %s126_s1 = inlined_call_operand.hbm [shape: f32[8,13], index: 1, kind: output, shape index: {}]  }
   0x1   :  { %7 = vsyncpa [#allocation4], 0  ;;  %s89_s6 = smov [#allocation2]   ;;  %s41_s10 = scalar_lea.hbm %s125_s0, 128 }
   0x2   :  { %s14_s7 = sshll.u32 %s89_s6, 4  ;;  %p42_p0 = scmp.ne.s32.totalorder %s125_s0, %s41_s10  ;;  %s15_s7 = int_to_ptr.vmem [resolvable:$true] %s14_s7 }
   0x3   :  { %p45_p1 = scmp.lt.u32.totalorder %s41_s10, %s125_s0 }
   0x5   :  { %p47_p2 = pnand %p45_p1, %p42_p0 }
   0x7   :  { %50 = shalt.err (!%p47_p2)
}
   0x8   :  { %s51_s15 = scalar_lea.vmem %s15_s7, 128  ;;  %p56_p4 = scmp.lt.s32.totalorder %s15_s7, %s15_s7 }
   0x9   :  { %p52_p3 = scmp.ne.s32.totalorder %s15_s7, %s51_s15  ;;  %p57_p5 = scmp.lt.s32.totalorder %s51_s15, %s51_s15 }
   0xb   :  { %p58_p6 = por %p57_p5, %p56_p4 }
   0xd   :  { %p59_p7 = pnand %p58_p6, %p52_p3 }
   0xf   :  { %62 = shalt.err (!%p59_p7)
}
  0x10   :  { %17 = dma.hbm_to_vmem [thread:$0]  %s125_s0, 128, %s15_s7, [#allocation3]  }
  0x11   :  { %85 = dma.done.wait [#allocation3], 128  }
  0x12   :  { %86 = vsyncadd [#allocation3], 4294967168  ;;  %s90_s18 = smov [#allocation5]   ;;  %vm22_vm0 = vcmask 105472   ;;  %v21_v0 = vld [vmem:[#allocation2] sm:$0xff] }
  0x13   :  { %s30_s19 = sshll.u32 %s90_s18, 4  ;;  %23 = vst.msk [vmem:[#allocation5] sm:$0xff] %vm22_vm0, %v21_v0  ;;  %s31_s19 = int_to_ptr.vmem [resolvable:$true] %s30_s19 }
  0x14   :  { %s63_s20 = scalar_lea.vmem %s31_s19, 128  ;;  %p68_p9 = scmp.lt.s32.totalorder %s31_s19, %s31_s19 }
  0x15   :  { %p64_p8 = scmp.ne.s32.totalorder %s31_s19, %s63_s20  ;;  %p69_p10 = scmp.lt.s32.totalorder %s63_s20, %s63_s20 }
  0x17   :  { %p70_p11 = por %p69_p10, %p68_p9 }
  0x19   :  { %p71_p12 = pnand %p70_p11, %p64_p8 }
  0x1b   :  { %74 = shalt.err (!%p71_p12)
}
  0x1c   :  { %s75_s23 = scalar_lea.hbm %s126_s1, 128 }
  0x1d   :  { %p76_p13 = scmp.ne.s32.totalorder %s126_s1, %s75_s23  ;;  %p79_p0 = scmp.lt.u32.totalorder %s75_s23, %s126_s1 }
  0x1f   :  { %p81_p1 = pnand %p79_p0, %p76_p13 }
  0x21   :  { %84 = shalt.err (!%p81_p1)
}
  0x22   :  { %33 = dma.vmem_to_hbm [thread:$0]  %s31_s19, 128, %s126_s1, [#allocation4]  }
  0x23   :  { %87 = dma.done.wait [#allocation4], 128  }
  0x24   :  { %88 = vsyncadd [#allocation4], 4294967168 }
  0x25   :  { %37 = vsyncpa [#allocation3], 1 }
  0x26   :  { %38 = vsyncpa [#allocation4], 1 }

</bundles_post_ra>
